<compile_context>
chip_gen: v6e
topology: v6e:2x2x1
jax: 0.10.0
libtpu: 0.0.40
codegen_flags: <defaults>
</compile_context>

<pallas_src>
import functools

import jax
import jax.numpy as jnp
import numpy as np
from jax import lax
from jax.experimental import pallas as pl
from jax.experimental.pallas import tpu as pltpu


# --------------------- Kernel A: hoisted LSTM input projection ---------------
def input_projection_kernel(x0_ref, x1_ref, x2_ref, x3_ref,
                            wa_ref, wb_ref, wc_ref, wd_ref, b_ref, out_ref):
    # x*_ref: (B, tt, D) f32 blocks; w*_ref: (D, 4H) bf16; b_ref: (1, 4H) f32
    # out_ref: (B, tt, 4H) f32 — gates = sum_k x_k @ w_k + b (bias folded once)
    B, tt, D = x0_ref.shape
    G = out_ref.shape[2]
    acc = jnp.zeros((B * tt, G), jnp.float32)
    for x_ref, w_ref in ((x0_ref, wa_ref), (x1_ref, wb_ref),
                         (x2_ref, wc_ref), (x3_ref, wd_ref)):
        xm = x_ref[...].reshape(B * tt, D).astype(jnp.bfloat16)
        acc = acc + jnp.dot(xm, w_ref[...], preferred_element_type=jnp.float32)
    out_ref[...] = (acc + b_ref[...]).reshape(B, tt, G)


def project_inputs(xs, w_slabs, b_lstm, *, tt_proj):
    B, T, D = xs[0].shape
    G = w_slabs[0].shape[1]
    grid = (pl.cdiv(T, tt_proj),)
    in_specs = (
        [pl.BlockSpec((B, tt_proj, D), lambda t: (0, t, 0)) for _ in range(4)]
        + [pl.BlockSpec((D, G), lambda t: (0, 0)) for _ in range(4)]
        + [pl.BlockSpec((1, G), lambda t: (0, 0))]
    )
    out_specs = pl.BlockSpec((B, tt_proj, G), lambda t: (0, t, 0))
    return pl.pallas_call(
        input_projection_kernel,
        out_shape=jax.ShapeDtypeStruct((B, T, G), jnp.float32),
        grid=grid,
        in_specs=in_specs,
        out_specs=out_specs,
        compiler_params=pltpu.CompilerParams(
            dimension_semantics=("parallel",)),       # independent over time
    )(*xs, *w_slabs, b_lstm)


# ------------- Kernel B: fused LSTM recurrence + classification head ---------
def fused_lstm_head_kernel(g_ref, whh_ref, w0_ref,
                           b0_ref, s1_ref, t1_ref, w1_ref, b1_ref,
                           s2_ref, t2_ref, w2_ref, b2_ref,
                           out_ref, h_sc, c_sc, acc_sc,
                           *, H, tt, seq_len):
    # g_ref:  (B, tt, 4H) f32 precomputed gates for this time tile
    # whh_ref:(H, 4H) bf16 recurrent weights (VMEM resident across grid)
    # w0_ref: (tt, H, h0) bf16 — the fc0 weight K-tile for these timesteps
    # scratch: h_sc/c_sc (B,H) f32 LSTM state, acc_sc (B,h0) f32 fc0 accumulator
    ti = pl.program_id(0)

    @pl.when(ti == 0)
    def _init():
        h_sc[...] = jnp.zeros_like(h_sc)
        c_sc[...] = jnp.zeros_like(c_sc)
        acc_sc[...] = jnp.zeros_like(acc_sc)

    whh = whh_ref[...]                                 # hoisted, loaded once

    def one_step(j):
        h = h_sc[...]
        c = c_sc[...]
        g = g_ref[:, j, :] + jnp.dot(h.astype(jnp.bfloat16), whh,
                                     preferred_element_type=jnp.float32)
        i_g = jax.nn.sigmoid(g[:, 0 * H:1 * H])        # PyTorch gate order i,f,g,o
        f_g = jax.nn.sigmoid(g[:, 1 * H:2 * H])
        g_g = jnp.tanh(g[:, 2 * H:3 * H])
        o_g = jax.nn.sigmoid(g[:, 3 * H:4 * H])
        c_new = f_g * c + i_g * g_g
        h_new = o_g * jnp.tanh(c_new)
        c_sc[...] = c_new
        h_sc[...] = h_new
        # flatten(x,1) @ w0  ==  sum_t h_t @ w0[t*H:(t+1)*H]  (K-tiled by time)
        acc_sc[...] += jnp.dot(h_new.astype(jnp.bfloat16), w0_ref[j],
                               preferred_element_type=jnp.float32)

    for j in range(tt):                                # static unroll
        if seq_len % tt == 0:
            one_step(j)
        else:
            @pl.when(ti * tt + j < seq_len)            # mask padded timesteps
            def _step(j=j):
                one_step(j)

    @pl.when(ti == pl.num_programs(0) - 1)
    def _epilogue():
        # dropout = identity in eval mode
        z = acc_sc[...] + b0_ref[...]                  # fc0 bias
        z = z * s1_ref[...] + t1_ref[...]              # bn1 (folded running stats)
        z = jnp.maximum(z, 0.0)                        # relu
        z = jnp.dot(z.astype(jnp.bfloat16), w1_ref[...],
                    preferred_element_type=jnp.float32) + b1_ref[...]   # fc1
        z = jnp.maximum(z, 0.0)                        # relu (before bn2, as in ref)
        z = z * s2_ref[...] + t2_ref[...]              # bn2 (folded)
        # fc2 with N=1: VPU multiply + lane reduction instead of MXU matmul
        out_ref[...] = (jnp.sum(z * w2_ref[...], axis=-1, keepdims=True)
                        + b2_ref[...])


def lstm_and_head(gates, kp, *, tt):
    B, T, G = gates.shape
    H = kp["w_hh"].shape[0]
    H0 = kp["w0_r"].shape[2]
    H1 = kp["w1"].shape[1]
    grid = (pl.cdiv(T, tt),)
    kernel = functools.partial(fused_lstm_head_kernel, H=H, tt=tt, seq_len=T)
    in_specs = [
        pl.BlockSpec((B, tt, G), lambda t: (0, t, 0)),     # gates (streamed)
        pl.BlockSpec((H, G), lambda t: (0, 0)),            # w_hh (resident)
        pl.BlockSpec((tt, H, H0), lambda t: (t, 0, 0)),    # w0 K-tile (streamed)
        pl.BlockSpec((1, H0), lambda t: (0, 0)),           # b0
        pl.BlockSpec((1, H0), lambda t: (0, 0)),           # s1
        pl.BlockSpec((1, H0), lambda t: (0, 0)),           # t1
        pl.BlockSpec((H0, H1), lambda t: (0, 0)),          # w1
        pl.BlockSpec((1, H1), lambda t: (0, 0)),           # b1
        pl.BlockSpec((1, H1), lambda t: (0, 0)),           # s2
        pl.BlockSpec((1, H1), lambda t: (0, 0)),           # t2
        pl.BlockSpec((1, H1), lambda t: (0, 0)),           # w2 (as row)
        pl.BlockSpec((1, 1), lambda t: (0, 0)),            # b2
    ]
    return pl.pallas_call(
        kernel,
        out_shape=jax.ShapeDtypeStruct((B, 1), jnp.float32),
        grid=grid,
        in_specs=in_specs,
        out_specs=pl.BlockSpec((B, 1), lambda t: (0, 0)),
        scratch_shapes=[pltpu.VMEM((B, H), jnp.float32),
                        pltpu.VMEM((B, H), jnp.float32),
                        pltpu.VMEM((B, H0), jnp.float32)],
        compiler_params=pltpu.CompilerParams(
            dimension_semantics=("arbitrary",)),       # sequential recurrence
    )(gates, kp["w_hh"], kp["w0_r"], kp["b0"], kp["s1"], kp["t1"],
      kp["w1"], kp["b1"], kp["s2"], kp["t2"], kp["w2_row"], kp["b2"])


# --------------------------------- forward -----------------------------------
def modified_sheikh_forward(hidden_states, kp, *, tt=8, tt_proj=8):
    # TODO(synk): wav2vec2 pretrained transformer + AutoFeatureExtractor are an
    # external checkpoint and are not reimplemented; we start from hidden_states.
    xs = [hidden_states[i] for i in (0, 5, 10, 12)]    # concat folded into 4 slabs
    T = xs[0].shape[1]
    tt = min(tt, T)
    tt_proj = min(tt_proj, T)
    gates = project_inputs(xs, kp["w_ih_slabs"], kp["b_lstm"], tt_proj=tt_proj)
    return lstm_and_head(gates, kp, tt=tt)             # (B, 1)


# --------------------------- parameter preparation ---------------------------
def _make_params(key, din, H, T, h0, h1):
    """Canonical f32 parameters (PyTorch-equivalent layouts, BN folded)."""
    eps = 1e-5
    ks = jax.random.split(key, 12)

    def u(k, shape, fan_in):
        s = 1.0 / np.sqrt(fan_in)
        return jax.random.uniform(k, shape, jnp.float32, -s, s)

    def bn(k, n):
        k1, k2, k3, k4 = jax.random.split(k, 4)
        gamma = 1.0 + 0.1 * jax.random.normal(k1, (1, n), jnp.float32)
        beta = 0.05 * jax.random.normal(k2, (1, n), jnp.float32)
        mean = 0.1 * jax.random.normal(k3, (1, n), jnp.float32)
        var = 1.0 + 0.2 * jax.random.uniform(k4, (1, n), jnp.float32)
        s = gamma / jnp.sqrt(var + eps)
        t = beta - mean * s
        return s, t

    s1, t1 = bn(ks[10], h0)
    s2, t2 = bn(ks[11], h1)
    return {
        # LSTM(4*D -> H), PyTorch gate order i,f,g,o; bias = b_ih + b_hh
        "w_ih": u(ks[0], (din, 4 * H), H),
        "w_hh": u(ks[1], (H, 4 * H), H),
        "b_lstm": u(ks[2], (1, 4 * H), H),
        # ClassificationLayer(in_dim=T*H, h0, h1)
        "w0": u(ks[3], (T * H, h0), T * H), "b0": u(ks[4], (1, h0), T * H),
        "w1": u(ks[5], (h0, h1), h0),       "b1": u(ks[6], (1, h1), h0),
        "w2": u(ks[7], (h1, 1), h1),        "b2": u(ks[8], (1, 1), h1),
        "s1": s1, "t1": t1, "s2": s2, "t2": t2,
    }


def _prepare_kernel_params(p, *, T, H, D):
    """One-time prep: split w_ih into 4 slabs, reshape w0 by time, bf16 weights."""
    w_ih = p["w_ih"]                                       # (4D, 4H)
    slabs = tuple(w_ih[k * D:(k + 1) * D].astype(jnp.bfloat16) for k in range(4))
    return {
        "w_ih_slabs": slabs,                               # 4 x (D, 4H) bf16
        "b_lstm": p["b_lstm"],                             # (1, 4H) f32
        "w_hh": p["w_hh"].astype(jnp.bfloat16),            # (H, 4H) bf16
        "w0_r": p["w0"].reshape(T, H, -1).astype(jnp.bfloat16),  # (T, H, h0) bf16
        "b0": p["b0"], "s1": p["s1"], "t1": p["t1"],
        "w1": p["w1"].astype(jnp.bfloat16), "b1": p["b1"],
        "s2": p["s2"], "t2": p["t2"],
        "w2_row": p["w2"].reshape(1, -1),                  # (1, h1) f32
        "b2": p["b2"],                                     # (1, 1) f32
    }


# ------------------------------ pure-JAX reference ---------------------------
def _reference_forward(hidden_states, kp):
    H = kp["w_hh"].shape[0]
    xs = [hidden_states[i] for i in (0, 5, 10, 12)]
    B, T, D = xs[0].shape
    G = 4 * H
    gates = jnp.zeros((B * T, G), jnp.float32)
    for x, w in zip(xs, kp["w_ih_slabs"]):
        gates = gates + jnp.dot(x.reshape(B * T, D).astype(jnp.bfloat16), w,
                                preferred_element_type=jnp.float32)
    gates = (gates + kp["b_lstm"]).reshape(B, T, G)

    def step(carry, g_t):
        h, c = carry
        g = g_t + jnp.dot(h.astype(jnp.bfloat16), kp["w_hh"],
                          preferred_element_type=jnp.float32)
        i = jax.nn.sigmoid(g[:, 0 * H:1 * H])
        f = jax.nn.sigmoid(g[:, 1 * H:2 * H])
        gg = jnp.tanh(g[:, 2 * H:3 * H])
        o = jax.nn.sigmoid(g[:, 3 * H:4 * H])
        c = f * c + i * gg
        h = o * jnp.tanh(c)
        return (h, c), h

    init = (jnp.zeros((B, H), jnp.float32), jnp.zeros((B, H), jnp.float32))
    _, hs = lax.scan(step, init, jnp.swapaxes(gates, 0, 1))
    hs = jnp.swapaxes(hs, 0, 1)                            # (B, T, H)

    flat = hs.reshape(B, T * H).astype(jnp.bfloat16)       # torch.flatten(x, 1)
    w0 = kp["w0_r"].reshape(T * H, -1)
    z = jnp.dot(flat, w0, preferred_element_type=jnp.float32) + kp["b0"]
    z = jnp.maximum(z * kp["s1"] + kp["t1"], 0.0)
    z = jnp.dot(z.astype(jnp.bfloat16), kp["w1"],
                preferred_element_type=jnp.float32) + kp["b1"]
    z = jnp.maximum(z, 0.0)
    z = z * kp["s2"] + kp["t2"]
    return jnp.sum(z * kp["w2_row"], axis=-1, keepdims=True) + kp["b2"]


# ----------------------------------- main ------------------------------------
if __name__ == "__main__":
    # Small, module-consistent shapes (scaled from T=149, D=768, H=512, h0=512,
    # h1=64); H/D/h0 kept multiples of 128 so gate slices stay lane-aligned.
    B, T, D, H, H0, H1 = 2, 16, 128, 128, 128, 64
    N_LAYERS = 13                      # wav2vec2-base emits 13 hidden states

    key = jax.random.PRNGKey(0)
    k_hs, k_p = jax.random.split(key)
    hs_keys = jax.random.split(k_hs, N_LAYERS)
    hidden_states = [jax.random.normal(k, (B, T, D), jnp.float32) for k in hs_keys]

    raw_params = _make_params(k_p, 4 * D, H, T, H0, H1)
    kparams = _prepare_kernel_params(raw_params, T=T, H=H, D=D)

    out = modified_sheikh_forward(hidden_states, kparams)
    out = jax.block_until_ready(out)
    assert out.shape == (B, 1) and out.dtype == jnp.float32

    ref = jax.block_until_ready(_reference_forward(hidden_states, kparams))
    np.testing.assert_allclose(np.asarray(out), np.asarray(ref),
                               rtol=2e-2, atol=2e-2)

    print("KERNEL_OK")
</pallas_src>

<mosaic_0001>
module attributes {stable_mosaic.version = 11 : i64} {
  func.func @input_projection_kernel(%arg0: i32, %arg1: memref<2x8x128xf32, #tpu.memory_space<vmem>>, %arg2: memref<2x8x128xf32, #tpu.memory_space<vmem>>, %arg3: memref<2x8x128xf32, #tpu.memory_space<vmem>>, %arg4: memref<2x8x128xf32, #tpu.memory_space<vmem>>, %arg5: memref<128x512xbf16, #tpu.memory_space<vmem>>, %arg6: memref<128x512xbf16, #tpu.memory_space<vmem>>, %arg7: memref<128x512xbf16, #tpu.memory_space<vmem>>, %arg8: memref<128x512xbf16, #tpu.memory_space<vmem>>, %arg9: memref<1x512xf32, #tpu.memory_space<vmem>>, %arg10: memref<2x8x512xf32, #tpu.memory_space<vmem>>) attributes {dimension_semantics = [#tpu.dimension_semantics<parallel>], iteration_bounds = array<i64: 2>, scalar_prefetch = 0 : i64, scratch_operands = 0 : i64, tpu.core_type = #tpu.core_type<tc>, window_params = [{transform_indices = @transform_0, window_bounds = array<i64: 2, 8, 128>}, {transform_indices = @transform_1, window_bounds = array<i64: 2, 8, 128>}, {transform_indices = @transform_2, window_bounds = array<i64: 2, 8, 128>}, {transform_indices = @transform_3, window_bounds = array<i64: 2, 8, 128>}, {pipeline_mode = #tpu.pipeline_mode<synchronous>, transform_indices = @transform_4, window_bounds = array<i64: 128, 512>}, {pipeline_mode = #tpu.pipeline_mode<synchronous>, transform_indices = @transform_5, window_bounds = array<i64: 128, 512>}, {pipeline_mode = #tpu.pipeline_mode<synchronous>, transform_indices = @transform_6, window_bounds = array<i64: 128, 512>}, {pipeline_mode = #tpu.pipeline_mode<synchronous>, transform_indices = @transform_7, window_bounds = array<i64: 128, 512>}, {pipeline_mode = #tpu.pipeline_mode<synchronous>, transform_indices = @transform_8, window_bounds = array<i64: 1, 512>}, {transform_indices = @transform_9, window_bounds = array<i64: 2, 8, 512>}]} {
    %cst = arith.constant 0.000000e+00 : f32
    %0 = vector.broadcast %cst : f32 to vector<16x512xf32>
    %c0 = arith.constant 0 : index
    %c0_0 = arith.constant 0 : index
    %c0_1 = arith.constant 0 : index
    %1 = vector.load %arg1[%c0, %c0_0, %c0_1] : memref<2x8x128xf32, #tpu.memory_space<vmem>>, vector<2x8x128xf32>
    %2 = vector.shape_cast %1 : vector<2x8x128xf32> to vector<16x128xf32>
    %3 = arith.truncf %2 : vector<16x128xf32> to vector<16x128xbf16>
    %c0_2 = arith.constant 0 : index
    %c0_3 = arith.constant 0 : index
    %4 = vector.load %arg5[%c0_2, %c0_3] : memref<128x512xbf16, #tpu.memory_space<vmem>>, vector<128x512xbf16>
    %cst_4 = arith.constant dense<0.000000e+00> : vector<16x512xf32>
    %5 = tpu.matmul %3, %4, %cst_4 {dimension_numbers = #tpu.dot_dimension_numbers<[1], [0], [0], [1], [0, 0, 1, 1], [], []>} : vector<16x128xbf16>, vector<128x512xbf16>, vector<16x512xf32> -> vector<16x512xf32>
    %6 = arith.addf %0, %5 : vector<16x512xf32>
    %c0_5 = arith.constant 0 : index
    %c0_6 = arith.constant 0 : index
    %c0_7 = arith.constant 0 : index
    %7 = vector.load %arg2[%c0_5, %c0_6, %c0_7] : memref<2x8x128xf32, #tpu.memory_space<vmem>>, vector<2x8x128xf32>
    %8 = vector.shape_cast %7 : vector<2x8x128xf32> to vector<16x128xf32>
    %9 = arith.truncf %8 : vector<16x128xf32> to vector<16x128xbf16>
    %c0_8 = arith.constant 0 : index
    %c0_9 = arith.constant 0 : index
    %10 = vector.load %arg6[%c0_8, %c0_9] : memref<128x512xbf16, #tpu.memory_space<vmem>>, vector<128x512xbf16>
    %cst_10 = arith.constant dense<0.000000e+00> : vector<16x512xf32>
    %11 = tpu.matmul %9, %10, %cst_10 {dimension_numbers = #tpu.dot_dimension_numbers<[1], [0], [0], [1], [0, 0, 1, 1], [], []>} : vector<16x128xbf16>, vector<128x512xbf16>, vector<16x512xf32> -> vector<16x512xf32>
    %12 = arith.addf %6, %11 : vector<16x512xf32>
    %c0_11 = arith.constant 0 : index
    %c0_12 = arith.constant 0 : index
    %c0_13 = arith.constant 0 : index
    %13 = vector.load %arg3[%c0_11, %c0_12, %c0_13] : memref<2x8x128xf32, #tpu.memory_space<vmem>>, vector<2x8x128xf32>
    %14 = vector.shape_cast %13 : vector<2x8x128xf32> to vector<16x128xf32>
    %15 = arith.truncf %14 : vector<16x128xf32> to vector<16x128xbf16>
    %c0_14 = arith.constant 0 : index
    %c0_15 = arith.constant 0 : index
    %16 = vector.load %arg7[%c0_14, %c0_15] : memref<128x512xbf16, #tpu.memory_space<vmem>>, vector<128x512xbf16>
    %cst_16 = arith.constant dense<0.000000e+00> : vector<16x512xf32>
    %17 = tpu.matmul %15, %16, %cst_16 {dimension_numbers = #tpu.dot_dimension_numbers<[1], [0], [0], [1], [0, 0, 1, 1], [], []>} : vector<16x128xbf16>, vector<128x512xbf16>, vector<16x512xf32> -> vector<16x512xf32>
    %18 = arith.addf %12, %17 : vector<16x512xf32>
    %c0_17 = arith.constant 0 : index
    %c0_18 = arith.constant 0 : index
    %c0_19 = arith.constant 0 : index
    %19 = vector.load %arg4[%c0_17, %c0_18, %c0_19] : memref<2x8x128xf32, #tpu.memory_space<vmem>>, vector<2x8x128xf32>
    %20 = vector.shape_cast %19 : vector<2x8x128xf32> to vector<16x128xf32>
    %21 = arith.truncf %20 : vector<16x128xf32> to vector<16x128xbf16>
    %c0_20 = arith.constant 0 : index
    %c0_21 = arith.constant 0 : index
    %22 = vector.load %arg8[%c0_20, %c0_21] : memref<128x512xbf16, #tpu.memory_space<vmem>>, vector<128x512xbf16>
    %cst_22 = arith.constant dense<0.000000e+00> : vector<16x512xf32>
    %23 = tpu.matmul %21, %22, %cst_22 {dimension_numbers = #tpu.dot_dimension_numbers<[1], [0], [0], [1], [0, 0, 1, 1], [], []>} : vector<16x128xbf16>, vector<128x512xbf16>, vector<16x512xf32> -> vector<16x512xf32>
    %24 = arith.addf %18, %23 : vector<16x512xf32>
    %c0_23 = arith.constant 0 : index
    %c0_24 = arith.constant 0 : index
    %25 = vector.load %arg9[%c0_23, %c0_24] : memref<1x512xf32, #tpu.memory_space<vmem>>, vector<1x512xf32>
    %26 = vector.broadcast %25 : vector<1x512xf32> to vector<16x512xf32>
    %27 = arith.addf %24, %26 : vector<16x512xf32>
    %28 = vector.shape_cast %27 : vector<16x512xf32> to vector<2x8x512xf32>
    %c0_25 = arith.constant 0 : index
    %c0_26 = arith.constant 0 : index
    %c0_27 = arith.constant 0 : index
    %29 = vector.load %arg10[%c0_25, %c0_26, %c0_27] : memref<2x8x512xf32, #tpu.memory_space<vmem>>, vector<2x8x512xf32>
    tpu.vector_store %arg10[%c0_25, %c0_26, %c0_27], %28 {strides = array<i32>} : memref<2x8x512xf32, #tpu.memory_space<vmem>>, vector<2x8x512xf32>,
    return
  }
  func.func @transform_0(%arg0: i32) -> (i32, i32, i32) {
    %c0_i32 = arith.constant 0 : i32
    %c0_i32_0 = arith.constant 0 : i32
    %c0_i32_1 = arith.constant 0 : i32
    return %c0_i32, %arg0, %c0_i32_0 : i32, i32, i32
  }
  func.func @transform_1(%arg0: i32) -> (i32, i32, i32) {
    %c0_i32 = arith.constant 0 : i32
    %c0_i32_0 = arith.constant 0 : i32
    %c0_i32_1 = arith.constant 0 : i32
    return %c0_i32, %arg0, %c0_i32_0 : i32, i32, i32
  }
  func.func @transform_2(%arg0: i32) -> (i32, i32, i32) {
    %c0_i32 = arith.constant 0 : i32
    %c0_i32_0 = arith.constant 0 : i32
    %c0_i32_1 = arith.constant 0 : i32
    return %c0_i32, %arg0, %c0_i32_0 : i32, i32, i32
  }
  func.func @transform_3(%arg0: i32) -> (i32, i32, i32) {
    %c0_i32 = arith.constant 0 : i32
    %c0_i32_0 = arith.constant 0 : i32
    %c0_i32_1 = arith.constant 0 : i32
    return %c0_i32, %arg0, %c0_i32_0 : i32, i32, i32
  }
  func.func @transform_4(%arg0: i32) -> (i32, i32) {
    %c0_i32 = arith.constant 0 : i32
    %c0_i32_0 = arith.constant 0 : i32
    %c0_i32_1 = arith.constant 0 : i32
    return %c0_i32, %c0_i32_0 : i32, i32
  }
  func.func @transform_5(%arg0: i32) -> (i32, i32) {
    %c0_i32 = arith.constant 0 : i32
    %c0_i32_0 = arith.constant 0 : i32
    %c0_i32_1 = arith.constant 0 : i32
    return %c0_i32, %c0_i32_0 : i32, i32
  }
  func.func @transform_6(%arg0: i32) -> (i32, i32) {
    %c0_i32 = arith.constant 0 : i32
    %c0_i32_0 = arith.constant 0 : i32
    %c0_i32_1 = arith.constant 0 : i32
    return %c0_i32, %c0_i32_0 : i32, i32
  }
  func.func @transform_7(%arg0: i32) -> (i32, i32) {
    %c0_i32 = arith.constant 0 : i32
    %c0_i32_0 = arith.constant 0 : i32
    %c0_i32_1 = arith.constant 0 : i32
    return %c0_i32, %c0_i32_0 : i32, i32
  }
  func.func @transform_8(%arg0: i32) -> (i32, i32) {
    %c0_i32 = arith.constant 0 : i32
    %c0_i32_0 = arith.constant 0 : i32
    %c0_i32_1 = arith.constant 0 : i32
    return %c0_i32, %c0_i32_0 : i32, i32
  }
  func.func @transform_9(%arg0: i32) -> (i32, i32, i32) {
    %c0_i32 = arith.constant 0 : i32
    %c0_i32_0 = arith.constant 0 : i32
    %c0_i32_1 = arith.constant 0 : i32
    return %c0_i32, %arg0, %c0_i32_0 : i32, i32, i32
  }
}

</mosaic_0001>

<bundles_post_ra>
// kernel: tpu_custom_call.1
= control target key start
LH: loop header
LB: loop body
LE: loop exit
PB: predicated region body
PF: predicated region fallthrough
CT: control target
= control target key end

     0   :  { %s3118_s0 = inlined_call_operand.hbm [shape: f32[2,16,128], index: 0, kind: input, shape index: {}]   ;;  %s3119_s1 = inlined_call_operand.hbm [shape: f32[2,16,128], index: 1, kind: input, shape index: {}]   ;;  %s3120_s2 = inlined_call_operand.hbm [shape: f32[2,16,128], index: 2, kind: input, shape index: {}]   ;;  %s3121_s3 = inlined_call_operand.hbm [shape: f32[2,16,128], index: 3, kind: input, shape index: {}]   ;;  %s3122_s4 = inlined_call_operand.hbm [shape: bf16[128,512], index: 4, kind: input, shape index: {}]   ;;  %s3123_s5 = inlined_call_operand.hbm [shape: bf16[128,512], index: 5, kind: input, shape index: {}]   ;;  %s3124_s6 = inlined_call_operand.hbm [shape: bf16[128,512], index: 6, kind: input, shape index: {}]   ;;  %s3125_s7 = inlined_call_operand.hbm [shape: bf16[128,512], index: 7, kind: input, shape index: {}]   ;;  %s3126_s8 = inlined_call_operand.vmem [shape: f32[1,512], index: 8, kind: input, shape index: {}]   ;;  %s3127_s9 = inlined_call_operand.hbm [shape: f32[2,16,512], index: 9, kind: output, shape index: {}]  }
   0x1   :  { %3151 = sst [smem:[#allocation29_spill]] %s3118_s0 }
   0x2   :  { %3152 = sst [smem:[#allocation30_spill]] %s3119_s1 }
   0x3   :  { %3153 = sst [smem:[#allocation31_spill]] %s3122_s4 }
   0x4   :  { %3154 = sst [smem:[#allocation32_spill]] %s3123_s5 }
   0x5   :  { %3155 = sst [smem:[#allocation33_spill]] %s3124_s6 }
   0x6   :  { %3156 = sst [smem:[#allocation34_spill]] %s3125_s7 }
   0x7   :  { %3157 = sst [smem:[#allocation35_spill]] %s3127_s9 }
   0x8   :  { %14 = vsyncpa [#allocation3], 0 }
   0x9   :  { %16 = vsyncpa [#allocation3 + $0x1], 0 }
   0xa   :  { %17 = vsyncpa [#allocation6], 0 }
   0xb   :  { %19 = vsyncpa [#allocation6 + $0x1], 0 }
   0xc   :  { %20 = vsyncpa [#allocation9], 0 }
   0xd   :  { %22 = vsyncpa [#allocation9 + $0x1], 0 }
   0xe   :  { %23 = vsyncpa [#allocation12], 0 }
   0xf   :  { %24 = vsyncpa [#allocation15], 0 }
  0x10   :  { %25 = vsyncpa [#allocation4], 0 }
  0x11   :  { %27 = vsyncpa [#allocation4 + $0x1], 0  ;;  %s2722_s30 = smov 0   ;;  %s2724_s10 = smov 0  }
  0x12   :  { %s2726_s11 = smov 0   ;;  %s2728_s12 = smov 0  }
  0x13 LB: > { %3158 = sst [smem:[#allocation24_spill]] %s2641_s30  ;;  %s2743_s13 = sadd.s32 4294967295, %s2653_s12   ;;  %s2653_s12 = sphi %s2728_s12, %s3200_s12   ;;  %s2649_s11 = sphi %s2726_s11, %s3202_s11   ;;  %s2645_s10 = sphi %s2724_s10, %s3204_s10   ;;  %s2641_s30 = sphi %s2722_s30, %s3203_s30  }
  0x14   : > { %3159 = sst [smem:[#allocation25_spill]] %s2649_s11  ;;  %s1892_s14 = sadd.s32 4294967294, %s2653_s12  }
  0x15   : > { %s2747_s15 = sadd.s32 1, %s2653_s12   ;;  %s40_s16 = sadd.s32 1, %s2649_s11 }
  0x16   : > { %3160 = sst [smem:[#allocation26_spill]] %s2747_s15  ;;  %s37_s17 = ssub.s32 %s2653_s12, %s2747_s15 }
  0x17   : > { %p47_p0 = scmp.ne.s32.totalorder %s2649_s11, %s2645_s10  ;;  %p38_p1 = scmp.eq.s32.totalorder %s37_s17, 0 }
  0x18   : > { %p48_p2 = scmp.eq.s32.totalorder %s2653_s12, 0  ;;  %p53_p3 = scmp.ne.s32.totalorder %s2645_s10, %s2641_s30 }
  0x19   : > { %p3129_p4 = scmp.eq.s32.totalorder %s2743_s13, 0  ;;  %p260_p7 = scmp.eq.s32.totalorder %s2743_s13, 1 }
  0x1a   : > { %s2759_s18 = scalar_select %p38_p1, %s2649_s11, %s40_s16  }
  0x1b   : > { %p2761_p5 = por %p48_p2, %p47_p0  ;;  %p2767_p6 = por %p3129_p4, %p53_p3 }
  0x1c   : > { %3161 = sst [smem:[#allocation27_spill]] %s2759_s18  ;;  %p266_p8 = scmp.eq.s32.totalorder %s1892_s14, 1 }
  0x1d   : > { %s3163_s20 = scalar_select %p2767_p6, 1, 0 }
  0x1e   : > { %p1893_p9 = scmp.ge.s32.totalorder %s2653_s12, 1  ;;  %p273_p10 = scmp.lt.s32.totalorder %s2653_s12, 3 }
  0x1f   : > { %p2774_p11 = por %p260_p7, %p47_p0  ;;  %p2778_p12 = por %p266_p8, %p53_p3 }
  0x20   : > { %p2782_p13 = pnand %p1893_p9, %p273_p10  ;;  %s2655_s24 = smov [#allocation10]  }
  0x21   : > { %s3164_s21 = scalar_select %p2774_p11, 1, 0 }
  0x22   : > { %s3165_s22 = scalar_select %p2778_p12, 1, 0 }
  0x23   : > { %s3167_s23 = scalar_select %p2782_p13, 1, 0 }
  0x24   : > { %3166 = sst [smem:[#allocation28_spill]] %s3165_s22  ;;  %p2077_p1 = pneg %p2782_p13 }
  0x25   : > { %s285_s25 = sshll.u32 %s2655_s24, 4  ;;  %p2111_p3 = scmp.lt.s32.totalorder %s2653_s12, 2  ;;  %s286_s25 = int_to_ptr.vmem [resolvable:$true] %s285_s25 }
  0x26   : > { %p2790_p2 = pnand %p2077_p1, %p3129_p4  ;;  %s2656_s27 = smov [#allocation11]  }
  0x27   : > { %s298_s28 = sshll.u32 %s2656_s27, 4  ;;  %s2364_s29 = scalar_lea.vmem %s286_s25, 4096  ;;  %s299_s28 = int_to_ptr.vmem [resolvable:$true] %s298_s28 }
  0x28   : > { %s3168_s26 = scalar_select %p2790_p2, 1, 0 }
  0x29   : > { %p3140_p7 = pneg %p2790_p2  ;;  %p2365_p8 = scmp.ne.s32.totalorder %s286_s25, %s2364_s29 }
  0x2a   : > { %p2372_p12 = scmp.lt.s32.totalorder %s286_s25, %s286_s25  ;;  %p2373_p11 = scmp.lt.s32.totalorder %s2364_s29, %s2364_s29 }
  0x2b   : > { %p2367_p9 = pnand %p2365_p8, %p3140_p7 }
  0x2c   : > { %p2374_p1 = por %p2373_p11, %p2372_p12 }
  0x2d   : > { %p2368_p10 = pneg %p2367_p9 }
  0x2f   : > { %p2375_p4 = pnand %p2374_p1, %p2368_p10 }
  0x31   : > { %2378 = shalt.err (!%p2375_p4)
}
  0x32   : > { %s3135_s14 = smov 256   ;;  %s3133_s16 = smov 16  }
  0x33   : > { %s3169_s4 = sld [smem:[#allocation31_spill]]  ;;  %s3132_s27 = sand.u32 1, %s2649_s11  }
  0x34   : > { %s2390_s18 = scalar_lea.vmem %s299_s28, 4096  ;;  %p2398_p12 = scmp.lt.s32.totalorder %s299_s28, %s299_s28 }
  0x35   : > { %p2391_p8 = scmp.ne.s32.totalorder %s299_s28, %s2390_s18  ;;  %p2399_p9 = scmp.lt.s32.totalorder %s2390_s18, %s2390_s18 }
  0x37   : > { %p2393_p4 = pnand %p2391_p8, %p3140_p7  ;;  %p2400_p10 = por %p2399_p9, %p2398_p12 }
  0x39   : > { %2080 = dma.hbm_to_vmem [thread:$0]  (!%p2790_p2), %s3169_s4, 4096, %s286_s25, [#allocation9], %s3135_s14, %s3135_s14, %s3133_s16  }
  0x3a   : > { %p2394_p11 = pneg %p2393_p4 }
  0x3c   : > { %p2401_p1 = pnand %p2400_p10, %p2394_p11 }
  0x3e   : > { %2404 = shalt.err (!%p2401_p1)
}
  0x3f   : > { %s3170_s5 = sld [smem:[#allocation32_spill]]  ;;  %s2823_s18 = sshll.u32 %s3132_s27, 4 }
  0x40   : > { %s2826_s17 = sshll.u32 %s2653_s12, 7  ;;  %p2832_p8 = pnand %p2111_p3, %p2761_p5 }
  0x41   : > { %s3138_s29 = sand.u32 1, %s2653_s12   ;;  %s3172_s1 = sld [smem:[#allocation30_spill]] }
  0x42   : > { %s2848_s19 = scalar_lea.sflag [#allocation6], %s3138_s29  ;;  %p2854_p3 = pneg %p2832_p8 }
  0x45   : > { %2083 = dma.hbm_to_vmem [thread:$0]  (!%p2790_p2), %s3170_s5, 4096, %s299_s28, [#allocation12], %s3135_s14, %s3135_s14, %s3133_s16  }
  0x46   : > { %s365_s28 = scalar_lea.vmem [#allocation5], %s2823_s18 }
  0x47   : > { %s2841_s15 = scalar_lea.hbm %s3172_s1, %s2826_s17  ;;  %s371_s27 = sshll.u32 %s365_s28, 4  ;;  %s2844_s27 = int_to_ptr.vmem [resolvable:$true] %s371_s27 }
  0x48   : > { %s2405_s16 = scalar_lea.hbm %s2841_s15, 256  ;;  %s2410_s28 = scalar_lea.hbm %s3172_s1, 512 }
  0x49   : > { %p2406_p5 = scmp.ne.s32.totalorder %s2841_s15, %s2405_s16  ;;  %p2411_p12 = scmp.lt.s32.totalorder %s2841_s15, %s3172_s1 }
  0x4a   : > { %p2412_p9 = scmp.lt.s32.totalorder %s2410_s28, %s2405_s16 }
  0x4b   : > { %p2408_p4 = pnand %p2854_p3, %p2406_p5 }
  0x4c   : > { %p2413_p10 = por %p2412_p9, %p2411_p12 }
  0x4d   : > { %p2409_p11 = pneg %p2408_p4 }
  0x4f   : > { %p2414_p1 = pnand %p2413_p10, %p2409_p11 }
  0x51   : > { %2417 = shalt.err (!%p2414_p1)
}
  0x52   : > { %s2418_s29 = scalar_lea.vmem %s2844_s27, 256  ;;  %s2659_s30 = smov [#allocation5]  }
  0x53   : > { %p2419_p0 = scmp.ne.s32.totalorder %s2844_s27, %s2418_s29  ;;  %s2423_s4 = sshll.u32 %s2659_s30, 4  ;;  %s2424_s4 = int_to_ptr.vmem [resolvable:$false] %s2423_s4 }
  0x54   : > { %s2425_s25 = scalar_lea.vmem %s2424_s4, 512  ;;  %p2426_p7 = scmp.lt.s32.totalorder %s2844_s27, %s2424_s4 }
  0x55   : > { %p2421_p5 = pnand %p2419_p0, %p2854_p3  ;;  %p2427_p6 = scmp.lt.s32.totalorder %s2425_s25, %s2418_s29 }
  0x57   : > { %p2422_p4 = pneg %p2421_p5  ;;  %p2428_p13 = por %p2427_p6, %p2426_p7 }
  0x59   : > { %p2429_p2 = pnand %p2428_p13, %p2422_p4 }
  0x5b   : > { %2432 = shalt.err (!%p2429_p2)
}
  0x5c   : > { %s3145_s5 = smov 128   ;;  %s3147_s22 = smov 8  }
  0x5d   : > { %s3174_s16 = smov 256   ;;  %s2662_s30 = smov [#allocation13]  }
  0x5e   : > { %2096 = dma.hbm_to_vmem [thread:$0]  (!%p2832_p8), %s2841_s15, 256, %s2844_s27, %s2848_s19, %s3174_s16, %s3145_s5, %s3147_s22  }
  0x5f   : > { %s311_s28 = sshll.u32 %s2662_s30, 4  ;;  %s2663_s4 = smov [#allocation14]   ;;  %s312_s28 = int_to_ptr.vmem [resolvable:$true] %s311_s28 }
  0x60   : > { %s324_s29 = sshll.u32 %s2663_s4, 4  ;;  %s2444_s25 = scalar_lea.vmem %s312_s28, 4096  ;;  %s325_s29 = int_to_ptr.vmem [resolvable:$true] %s324_s29 }
  0x61   : > { %p2445_p6 = scmp.ne.s32.totalorder %s312_s28, %s2444_s25  ;;  %p3175_p13 = scmp.ne.s32.totalorder %s3168_s26, 0 }
  0x62   : > { %p2452_p11 = scmp.lt.s32.totalorder %s312_s28, %s312_s28  ;;  %p2453_p12 = scmp.lt.s32.totalorder %s2444_s25, %s2444_s25 }
  0x63   : > { %p3176_p2 = pneg %p3175_p13 }
  0x64   : > { %p2454_p9 = por %p2453_p12, %p2452_p11 }
  0x65   : > { %p2447_p0 = pnand %p2445_p6, %p3176_p2 }
  0x67   : > { %p2448_p7 = pneg %p2447_p0 }
  0x69   : > { %p2455_p10 = pnand %p2454_p9, %p2448_p7 }
  0x6b   : > { %2458 = shalt.err (!%p2455_p10)
}
  0x6c   : > { %s3177_s1 = smov 16   ;;  %s3178_s6 = sld [smem:[#allocation33_spill]] }
  0x6d   : > { %s2470_s30 = scalar_lea.vmem %s325_s29, 4096  ;;  %p3179_p5 = pmov %p3176_p2 }
  0x6e   : > { %p2471_p1 = scmp.ne.s32.totalorder %s325_s29, %s2470_s30  ;;  %p2478_p2 = scmp.lt.s32.totalorder %s325_s29, %s325_s29 }
  0x6f   : > { %p2479_p0 = scmp.lt.s32.totalorder %s2470_s30, %s2470_s30 }
  0x70   : > { %p2473_p4 = pnand %p2471_p1, %p3179_p5 }
  0x71   : > { %p2480_p7 = por %p2479_p0, %p2478_p2 }
  0x72   : > { %2086 = dma.hbm_to_vmem [thread:$0]  (!%p3175_p13), %s3178_s6, 4096, %s312_s28, [#allocation12], %s3174_s16, %s3174_s16, %s3177_s1  }
  0x73   : > { %p2474_p6 = pneg %p2473_p4 }
  0x75   : > { %p2481_p11 = pnand %p2480_p7, %p2474_p6 }
  0x77   : > { %2484 = shalt.err (!%p2481_p11)
}
  0x78   : > { %s3180_s7 = sld [smem:[#allocation34_spill]]  ;;  %s345_s26 = scalar_lea.vmem [#allocation2], %s2823_s18 }
  0x79   : > { %s3181_s0 = sld [smem:[#allocation29_spill]]  ;;  %s351_s30 = sshll.u32 %s345_s26, 4  ;;  %s2909_s30 = int_to_ptr.vmem [resolvable:$true] %s351_s30 }
  0x7a   : > { %s2915_s25 = scalar_lea.hbm %s3120_s2, %s2826_s17  ;;  %s3182_s22 = sand.u32 1, %s2649_s11  }
  0x7b   : > { %s342_s6 = scalar_lea.sflag [#allocation3], %s3182_s22 }
  0x7e   : > { %2089 = dma.hbm_to_vmem [thread:$0]  (!%p3175_p13), %s3180_s7, 4096, %s325_s29, [#allocation15], %s3174_s16, %s3174_s16, %s3177_s1  }
  0x7f   : > { %s2906_s27 = scalar_lea.hbm %s3181_s0, %s2826_s17  ;;  %s2490_s15 = scalar_lea.hbm %s3181_s0, 512 }
  0x80   : > { %s2485_s1 = scalar_lea.hbm %s2906_s27, 256  ;;  %p2491_p10 = scmp.lt.s32.totalorder %s2906_s27, %s3181_s0 }
  0x81   : > { %p2486_p13 = scmp.ne.s32.totalorder %s2906_s27, %s2485_s1  ;;  %p2492_p1 = scmp.lt.s32.totalorder %s2490_s15, %s2485_s1 }
  0x83   : > { %p2488_p12 = pnand %p2486_p13, %p2854_p3  ;;  %p2493_p5 = por %p2492_p1, %p2491_p10 }
  0x85   : > { %p2489_p9 = pneg %p2488_p12 }
  0x87   : > { %p2494_p4 = pnand %p2493_p5, %p2489_p9 }
  0x89   : > { %2497 = shalt.err (!%p2494_p4)
}
  0x8a   : > { %s2498_s5 = scalar_lea.vmem %s2909_s30, 256  ;;  %s2664_s22 = smov [#allocation2]  }
  0x8b   : > { %p2499_p6 = scmp.ne.s32.totalorder %s2909_s30, %s2498_s5  ;;  %s2503_s4 = sshll.u32 %s2664_s22, 4  ;;  %s2504_s4 = int_to_ptr.vmem [resolvable:$false] %s2503_s4 }
  0x8c   : > { %s2505_s29 = scalar_lea.vmem %s2504_s4, 512  ;;  %p2506_p7 = scmp.lt.s32.totalorder %s2909_s30, %s2504_s4 }
  0x8d   : > { %p2501_p2 = pnand %p2499_p6, %p2854_p3  ;;  %p2507_p11 = scmp.lt.s32.totalorder %s2505_s29, %s2498_s5 }
  0x8f   : > { %p2502_p0 = pneg %p2501_p2  ;;  %p2508_p13 = por %p2507_p11, %p2506_p7 }
  0x91   : > { %p2509_p12 = pnand %p2508_p13, %p2502_p0 }
  0x93   : > { %2512 = shalt.err (!%p2509_p12)
}
  0x94   : > { %s3183_s7 = smov 8   ;;  %s3184_s1 = smov 128  }
  0x95   : > { %2093 = dma.hbm_to_vmem [thread:$0]  (!%p2832_p8), %s2906_s27, 256, %s2909_s30, %s342_s6, %s3174_s16, %s3184_s1, %s3183_s7  }
  0x96   : > { %s385_s28 = scalar_lea.vmem [#allocation7], %s2823_s18  ;;  %s2949_s22 = scalar_lea.hbm %s3121_s3, %s2826_s17 }
  0x97   : > { %s391_s15 = sshll.u32 %s385_s28, 4  ;;  %s2513_s4 = scalar_lea.hbm %s2915_s25, 256  ;;  %s2943_s15 = int_to_ptr.vmem [resolvable:$true] %s391_s15 }
  0x98   : > { %p2514_p9 = scmp.ne.s32.totalorder %s2915_s25, %s2513_s4  ;;  %s2518_s11 = scalar_lea.hbm %s3120_s2, 512 }
  0x99   : > { %p2519_p5 = scmp.lt.s32.totalorder %s2915_s25, %s3120_s2  ;;  %p2520_p4 = scmp.lt.s32.totalorder %s2518_s11, %s2513_s4 }
  0x9a   : > { %p2516_p10 = pnand %p2514_p9, %p2854_p3 }
  0x9b   : > { %p2521_p6 = por %p2520_p4, %p2519_p5 }
  0x9c   : > { %p2517_p1 = pneg %p2516_p10 }
  0x9e   : > { %p2522_p2 = pnand %p2521_p6, %p2517_p1 }
  0xa0   : > { %2525 = shalt.err (!%p2522_p2)
}
  0xa1   : > { %s2526_s17 = scalar_lea.vmem %s2943_s15, 256  ;;  %s2665_s27 = smov [#allocation7]  }
  0xa2   : > { %p2527_p0 = scmp.ne.s32.totalorder %s2943_s15, %s2526_s17  ;;  %s2531_s0 = sshll.u32 %s2665_s27, 4  ;;  %s2532_s0 = int_to_ptr.vmem [resolvable:$false] %s2531_s0 }
  0xa3   : > { %s2533_s30 = scalar_lea.vmem %s2532_s0, 512  ;;  %p2534_p13 = scmp.lt.s32.totalorder %s2943_s15, %s2532_s0 }
  0xa4   : > { %p2529_p7 = pnand %p2527_p0, %p2854_p3  ;;  %p2535_p12 = scmp.lt.s32.totalorder %s2533_s30, %s2526_s17 }
  0xa6   : > { %p2530_p11 = pneg %p2529_p7  ;;  %p2536_p9 = por %p2535_p12, %p2534_p13 }
  0xa8   : > { %p2537_p10 = pnand %p2536_p9, %p2530_p11 }
  0xaa   : > { %2540 = shalt.err (!%p2537_p10)
}
  0xab   : > { %2099 = dma.hbm_to_vmem [thread:$0]  (!%p2832_p8), %s2915_s25, 256, %s2943_s15, %s2848_s19, %s3174_s16, %s3184_s1, %s3183_s7  }
  0xac   : > { %s405_s9 = scalar_lea.vmem [#allocation8], %s2823_s18  ;;  %s3185_s28 = sand.u32 1, %s2653_s12  }
  0xad   : > { %s411_s11 = sshll.u32 %s405_s9, 4  ;;  %s402_s26 = scalar_lea.sflag [#allocation9], %s3185_s28  ;;  %s2976_s11 = int_to_ptr.vmem [resolvable:$true] %s411_s11 }
  0xae   : > { %s2541_s5 = scalar_lea.hbm %s2949_s22, 256  ;;  %s2546_s6 = scalar_lea.hbm %s3121_s3, 512 }
  0xaf   : > { %p2542_p1 = scmp.ne.s32.totalorder %s2949_s22, %s2541_s5  ;;  %p2547_p6 = scmp.lt.s32.totalorder %s2949_s22, %s3121_s3 }
  0xb0   : > { %p2548_p2 = scmp.lt.s32.totalorder %s2546_s6, %s2541_s5 }
  0xb1   : > { %p2544_p5 = pnand %p2542_p1, %p2854_p3 }
  0xb2   : > { %p2549_p0 = por %p2548_p2, %p2547_p6 }
  0xb3   : > { %p2545_p4 = pneg %p2544_p5 }
  0xb5   : > { %p2550_p7 = pnand %p2549_p0, %p2545_p4 }
  0xb7   : > { %2553 = shalt.err (!%p2550_p7)
}
  0xb8   : > { %s2554_s18 = scalar_lea.vmem %s2976_s11, 256  ;;  %s2666_s19 = smov [#allocation8]  }
  0xb9   : > { %p2555_p11 = scmp.ne.s32.totalorder %s2976_s11, %s2554_s18  ;;  %s2559_s25 = sshll.u32 %s2666_s19, 4  ;;  %s2560_s25 = int_to_ptr.vmem [resolvable:$false] %s2559_s25 }
  0xba   : > { %s2561_s15 = scalar_lea.vmem %s2560_s25, 512  ;;  %p2562_p9 = scmp.lt.s32.totalorder %s2976_s11, %s2560_s25 }
  0xbb   : > { %p2557_p13 = pnand %p2555_p11, %p2854_p3  ;;  %p2563_p10 = scmp.lt.s32.totalorder %s2561_s15, %s2554_s18 }
  0xbd   : > { %p2558_p12 = pneg %p2557_p13  ;;  %p2564_p1 = por %p2563_p10, %p2562_p9 }
  0xbf   : > { %p2565_p5 = pnand %p2564_p1, %p2558_p12 }
  0xc1   : > { %2568 = shalt.err (!%p2565_p5)
}
  0xc2   : > { %2102 = dma.hbm_to_vmem [thread:$0]  (!%p2832_p8), %s2949_s22, 256, %s2976_s11, %s402_s26, %s3174_s16, %s3184_s1, %s3183_s7  }
  0xc3   : > { %p3186_p3 = scmp.ne.s32.totalorder %s3167_s23, 0 }
  0xc4   : > { %s3006_s14 = sand.u32 (!%p3186_p3), 1, %s2645_s10   ;;  %p3187_p4 = scmp.ne.s32.totalorder (!%p3186_p3), %s3163_s20, 0 }
  0xc5   : > { %423 = sbr.rel (%p3186_p3) target bundleno = 568 (0x238), region = 56  ;;  %s3009_s0 = sshll.u32 (!%p3186_p3), %s3006_s14, 4 }
  0xc6   : > { %s426_s30 = scalar_lea.sflag (!%p3186_p3), [#allocation3], %s3006_s14  ;;  %s429_s24 = scalar_lea.vmem (!%p3186_p3), [#allocation2], %s3009_s0 }
  0xca   : > { %2612 = dma.done.wait (%p3187_p4), %s426_s30, 256  }
  0xcb   : > { %2614 = vsyncadd (%p3187_p4), %s426_s30, 4294967040  ;;  %s434_s23 = sand.u32 1, %s2743_s13   ;;  %s438_s7 = scalar_lea.vmem [#allocation5], %s3009_s0 }
  0xcc   : > { %s435_s16 = scalar_lea.sflag [#allocation6], %s434_s23 }
  0xcd   : > { %2616 = dma.done.wait (%p3187_p4), %s435_s16, 512  }
  0xce   : > { %2618 = vsyncadd (%p3187_p4), %s435_s16, 4294966784  ;;  %s447_s1 = scalar_lea.vmem [#allocation7], %s3009_s0  ;;  %s453_s22 = scalar_lea.sflag [#allocation9], %s434_s23 }
  0xcf   : > { %s456_s9 = scalar_lea.vmem [#allocation8], %s3009_s0 }
  0xd0   : > { %2620 = dma.done.wait (%p3187_p4), %s453_s22, 256  }
  0xd1   : > { %2622 = vsyncadd (%p3187_p4), %s453_s22, 4294967040  ;;  %p3188_p8 = scmp.eq.s32.totalorder %s2743_s13, 0 }
  0xd3   : > { %2624 = dma.done.wait (%p3188_p8), [#allocation9], 4096   ;;  %p3189_p6 = pmov %p3188_p8 }
  0xd5   : > { %2626 = vsyncadd (%p3189_p6), [#allocation9], 4294963200  ;;  %p3190_p2 = pmov %p3189_p6 }
  0xd7   : > { %2628 = dma.done.wait (%p3190_p2), [#allocation12], 8192   ;;  %p3191_p0 = pmov %p3190_p2 }
  0xd9   : > { %2630 = vsyncadd (%p3191_p0), [#allocation12], 4294959104  ;;  %p3192_p7 = pmov %p3191_p0 }
  0xda   : > { %p3193_p11 = pmov %p3191_p0 }
  0xdb   : > { %2632 = dma.done.wait (%p3192_p7), [#allocation15], 4096  }
  0xdc   : > { %2634 = vsyncadd (%p3193_p11), [#allocation15], 4294963200  ;;  %v2667_v0 = vmov 0   ;;  %v2161_v1 = vld [vmem:[#allocation11 + $0xe4] ss:$16 sps:$4 sm:$0xff]   ;;  %v559_v34 = vld [vmem:[%s438_s7 + $0x8] sm:$0xff] }
  0xdd   : > { %785 = vmatprep.mubr.bf16.mxu0 %v2667_v0  ;;  %828 = vmatprep.mubr.bf16.mxu1 %v2667_v0  ;;  %v2163_v2 = vld [vmem:[#allocation11 + $0xec] ss:$16 sps:$4 sm:$0xff]   ;;  %v2165_v3 = vld [vmem:[#allocation11 + $0xe0] ss:$16 sps:$4 sm:$0xff]   ;;  %v2166_v4 = vld [vmem:[#allocation11 + $0xe8] ss:$16 sps:$4 sm:$0xff]  }
  0xde   : > { %753 = vmatprep.subr.bf16.mxu0 %v2161_v1  ;;  %796 = vmatprep.subr.bf16.mxu1 %v2163_v2  ;;  %v2167_v5 = vld [vmem:[#allocation11 + $0xc4] ss:$16 sps:$4 sm:$0xff]   ;;  %v2169_v6 = vld [vmem:[#allocation11 + $0xcc] ss:$16 sps:$4 sm:$0xff]   ;;  %v2171_v7 = vld [vmem:[#allocation11 + $0xc0] ss:$16 sps:$4 sm:$0xff]  }
  0xdf   : > { %754 = vmatpush1.bf16.msra.mxu0 %v2165_v3  ;;  %797 = vmatpush1.bf16.msra.mxu1 %v2166_v4  ;;  %v2172_v8 = vld [vmem:[#allocation11 + $0xc8] ss:$16 sps:$4 sm:$0xff]   ;;  %v2173_v9 = vld [vmem:[#allocation11 + $0xa4] ss:$16 sps:$4 sm:$0xff]   ;;  %v2175_v10 = vld [vmem:[#allocation11 + $0xac] ss:$16 sps:$4 sm:$0xff]  }
  0xe0   : > { %755 = vmatprep.subr.bf16.mxu0 %v2167_v5  ;;  %798 = vmatprep.subr.bf16.mxu1 %v2169_v6  ;;  %v2177_v11 = vld [vmem:[#allocation11 + $0xa0] ss:$16 sps:$4 sm:$0xff]   ;;  %v2178_v12 = vld [vmem:[#allocation11 + $0xa8] ss:$16 sps:$4 sm:$0xff]   ;;  %v2179_v13 = vld [vmem:[#allocation11 + $0x84] ss:$16 sps:$4 sm:$0xff]  }
  0xe1   : > { %v2181_v14 = vld [vmem:[#allocation11 + $0x8c] ss:$16 sps:$4 sm:$0xff]   ;;  %v2183_v15 = vld [vmem:[#allocation11 + $0x80] ss:$16 sps:$4 sm:$0xff]   ;;  %v2184_v16 = vld [vmem:[#allocation11 + $0x88] ss:$16 sps:$4 sm:$0xff]  }
  0xe2   : > { %v2185_v17 = vld [vmem:[#allocation11 + $0x64] ss:$16 sps:$4 sm:$0xff]   ;;  %v2187_v18 = vld [vmem:[#allocation11 + $0x6c] ss:$16 sps:$4 sm:$0xff]   ;;  %v2189_v19 = vld [vmem:[#allocation11 + $0x60] ss:$16 sps:$4 sm:$0xff]  }
  0xe3   : > { %756 = vmatpush1.bf16.msra.mxu0 %v2171_v7  ;;  %799 = vmatpush1.bf16.msra.mxu1 %v2172_v8  ;;  %v2190_v20 = vld [vmem:[#allocation11 + $0x68] ss:$16 sps:$4 sm:$0xff]   ;;  %v2191_v21 = vld [vmem:[#allocation11 + $0x44] ss:$16 sps:$4 sm:$0xff]   ;;  %v2193_v22 = vld [vmem:[#allocation11 + $0x4c] ss:$16 sps:$4 sm:$0xff]  }
  0xe4   : > { %757 = vmatprep.subr.bf16.mxu0 %v2173_v9  ;;  %800 = vmatprep.subr.bf16.mxu1 %v2175_v10  ;;  %v2195_v23 = vld [vmem:[#allocation11 + $0x40] ss:$16 sps:$4 sm:$0xff]   ;;  %v2196_v24 = vld [vmem:[#allocation11 + $0x48] ss:$16 sps:$4 sm:$0xff]   ;;  %v2197_v25 = vld [vmem:[#allocation11 + $0x24] ss:$16 sps:$4 sm:$0xff]  }
  0xe5   : > { %v2199_v26 = vld [vmem:[#allocation11 + $0x2c] ss:$16 sps:$4 sm:$0xff]   ;;  %v2201_v27 = vld [vmem:[#allocation11 + $0x20] ss:$16 sps:$4 sm:$0xff]   ;;  %v2202_v28 = vld [vmem:[#allocation11 + $0x28] ss:$16 sps:$4 sm:$0xff]  }
  0xe6   : > { %v2203_v29 = vld [vmem:[#allocation11 + $0x4] ss:$16 sps:$4 sm:$0xff]   ;;  %v2205_v30 = vld [vmem:[#allocation11 + $0xc] ss:$16 sps:$4 sm:$0xff]   ;;  %v2207_v31 = vld [vmem:[#allocation11] ss:$16 sps:$4 sm:$0xff]  }
  0xe7   : > { %758 = vmatpush1.bf16.msra.mxu0 %v2177_v11  ;;  %801 = vmatpush1.bf16.msra.mxu1 %v2178_v12  ;;  %v2208_v32 = vld [vmem:[#allocation11 + $0x8] ss:$16 sps:$4 sm:$0xff]   ;;  %v558_v33 = vld [vmem:[%s438_s7] sm:$0xff]  ;;  %v2214_v36 = vld [vmem:[#allocation10 + $0xec] ss:$16 sps:$4 sm:$0xff]   ;;  %s1916_s28 = sshll.u32 %s3006_s14, 6 }
  0xe8   : > { %759 = vmatprep.subr.bf16.mxu0 %v2179_v13  ;;  %802 = vmatprep.subr.bf16.mxu1 %v2181_v14  ;;  %v2211_v35 = vld [vmem:[#allocation10 + $0xe4] ss:$16 sps:$4 sm:$0xff]   ;;  %v560_v37 = vpack.c.bf16 %v559_v34, %v558_v33  ;;  %v2209_v38 = vld [vmem:[#allocation10 + $0xe0] ss:$16 sps:$4 sm:$0xff]   ;;  %v2212_v39 = vld [vmem:[#allocation10 + $0xe8] ss:$16 sps:$4 sm:$0xff]  }
  0xe9   : > { %v2217_v40 = vld [vmem:[#allocation10 + $0xc4] ss:$16 sps:$4 sm:$0xff]   ;;  %v2220_v41 = vld [vmem:[#allocation10 + $0xcc] ss:$16 sps:$4 sm:$0xff]   ;;  %v2215_v42 = vld [vmem:[#allocation10 + $0xc0] ss:$16 sps:$4 sm:$0xff]  }
  0xea   : > { %v2218_v43 = vld [vmem:[#allocation10 + $0xc8] ss:$16 sps:$4 sm:$0xff]   ;;  %v2223_v44 = vld [vmem:[#allocation10 + $0xa4] ss:$16 sps:$4 sm:$0xff]   ;;  %v2226_v45 = vld [vmem:[#allocation10 + $0xac] ss:$16 sps:$4 sm:$0xff]  }
  0xeb   : > { %760 = vmatpush1.bf16.msra.mxu0 %v2183_v15  ;;  %803 = vmatpush1.bf16.msra.mxu1 %v2184_v16  ;;  %v2221_v46 = vld [vmem:[#allocation10 + $0xa0] ss:$16 sps:$4 sm:$0xff]   ;;  %v2224_v47 = vld [vmem:[#allocation10 + $0xa8] ss:$16 sps:$4 sm:$0xff]   ;;  %v2229_v48 = vld [vmem:[#allocation10 + $0x84] ss:$16 sps:$4 sm:$0xff]  }
  0xec   : > { %761 = vmatprep.subr.bf16.mxu0 %v2185_v17  ;;  %804 = vmatprep.subr.bf16.mxu1 %v2187_v18  ;;  %v2232_v49 = vld [vmem:[#allocation10 + $0x8c] ss:$16 sps:$4 sm:$0xff]   ;;  %v2227_v50 = vld [vmem:[#allocation10 + $0x80] ss:$16 sps:$4 sm:$0xff]   ;;  %v2230_v51 = vld [vmem:[#allocation10 + $0x88] ss:$16 sps:$4 sm:$0xff]  }
  0xed   : > { %v2235_v52 = vld [vmem:[#allocation10 + $0x64] ss:$16 sps:$4 sm:$0xff]   ;;  %v2238_v53 = vld [vmem:[#allocation10 + $0x6c] ss:$16 sps:$4 sm:$0xff]   ;;  %v2233_v54 = vld [vmem:[#allocation10 + $0x60] ss:$16 sps:$4 sm:$0xff]  }
  0xee   : > { %v2236_v55 = vld [vmem:[#allocation10 + $0x68] ss:$16 sps:$4 sm:$0xff]   ;;  %v2241_v56 = vld [vmem:[#allocation10 + $0x44] ss:$16 sps:$4 sm:$0xff]   ;;  %v2244_v57 = vld [vmem:[#allocation10 + $0x4c] ss:$16 sps:$4 sm:$0xff]  }
  0xef   : > { %762 = vmatpush1.bf16.msra.mxu0 %v2189_v19  ;;  %805 = vmatpush1.bf16.msra.mxu1 %v2190_v20  ;;  %v2239_v58 = vld [vmem:[#allocation10 + $0x40] ss:$16 sps:$4 sm:$0xff]   ;;  %v2242_v59 = vld [vmem:[#allocation10 + $0x48] ss:$16 sps:$4 sm:$0xff]   ;;  %v2247_v60 = vld [vmem:[#allocation10 + $0x24] ss:$16 sps:$4 sm:$0xff]  }
  0xf0   : > { %763 = vmatprep.subr.bf16.mxu0 %v2191_v21  ;;  %806 = vmatprep.subr.bf16.mxu1 %v2193_v22  ;;  %v2250_v61 = vld [vmem:[#allocation10 + $0x2c] ss:$16 sps:$4 sm:$0xff]   ;;  %v2245_v62 = vld [vmem:[#allocation10 + $0x20] ss:$16 sps:$4 sm:$0xff]   ;;  %v2248_v63 = vld [vmem:[#allocation10 + $0x28] ss:$16 sps:$4 sm:$0xff]  }
  0xf1   : > { %v2253_v1 = vld [vmem:[#allocation10 + $0x4] ss:$16 sps:$4 sm:$0xff]   ;;  %v2256_v2 = vld [vmem:[#allocation10 + $0xc] ss:$16 sps:$4 sm:$0xff]   ;;  %v2251_v3 = vld [vmem:[#allocation10] ss:$16 sps:$4 sm:$0xff]  }
  0xf2   : > { %v2254_v4 = vld [vmem:[#allocation10 + $0x8] ss:$16 sps:$4 sm:$0xff]   ;;  %v523_v5 = vld [vmem:[%s429_s24] sm:$0xff]  ;;  %v2262_v8 = vld [vmem:[#allocation13 + $0xec] ss:$16 sps:$4 sm:$0xff]   ;;  %s521_s26 = scalar_lea.vmem [#allocation16], %s1916_s28 }
  0xf3   : > { %764 = vmatpush1.bf16.msra.mxu0 %v2195_v23  ;;  %807 = vmatpush1.bf16.msra.mxu1 %v2196_v24  ;;  %v524_v6 = vld [vmem:[%s429_s24 + $0x8] sm:$0xff]  ;;  %v2259_v7 = vld [vmem:[#allocation13 + $0xe4] ss:$16 sps:$4 sm:$0xff]   ;;  %v2257_v10 = vld [vmem:[#allocation13 + $0xe0] ss:$16 sps:$4 sm:$0xff]   ;;  %s1715_s5 = sshll.u32 %s521_s26, 4  ;;  %s3070_s5 = int_to_ptr.vmem [resolvable:$true] %s1715_s5 }
  0xf4   : > { %765 = vmatprep.subr.bf16.mxu0 %v2197_v25  ;;  %808 = vmatprep.subr.bf16.mxu1 %v2199_v26  ;;  %v525_v9 = vpack.c.bf16 %v524_v6, %v523_v5  ;;  %v2260_v11 = vld [vmem:[#allocation13 + $0xe8] ss:$16 sps:$4 sm:$0xff]   ;;  %v2265_v12 = vld [vmem:[#allocation13 + $0xc4] ss:$16 sps:$4 sm:$0xff]   ;;  %v2268_v13 = vld [vmem:[#allocation13 + $0xcc] ss:$16 sps:$4 sm:$0xff]  }
  0xf5   : > { %v2263_v14 = vld [vmem:[#allocation13 + $0xc0] ss:$16 sps:$4 sm:$0xff]   ;;  %v2266_v15 = vld [vmem:[#allocation13 + $0xc8] ss:$16 sps:$4 sm:$0xff]   ;;  %v2271_v16 = vld [vmem:[#allocation13 + $0xa4] ss:$16 sps:$4 sm:$0xff]  }
  0xf6   : > { %v2274_v17 = vld [vmem:[#allocation13 + $0xac] ss:$16 sps:$4 sm:$0xff]   ;;  %v2269_v18 = vld [vmem:[#allocation13 + $0xa0] ss:$16 sps:$4 sm:$0xff]   ;;  %v2272_v19 = vld [vmem:[#allocation13 + $0xa8] ss:$16 sps:$4 sm:$0xff]  }
  0xf7   : > { %766 = vmatpush1.bf16.msra.mxu0 %v2201_v27  ;;  %809 = vmatpush1.bf16.msra.mxu1 %v2202_v28  ;;  %v2277_v20 = vld [vmem:[#allocation13 + $0x84] ss:$16 sps:$4 sm:$0xff]   ;;  %v2280_v21 = vld [vmem:[#allocation13 + $0x8c] ss:$16 sps:$4 sm:$0xff]   ;;  %v2275_v22 = vld [vmem:[#allocation13 + $0x80] ss:$16 sps:$4 sm:$0xff]  }
  0xf8   : > { %767 = vmatprep.subr.bf16.mxu0 %v2203_v29  ;;  %810 = vmatprep.subr.bf16.mxu1 %v2205_v30  ;;  %v2278_v23 = vld [vmem:[#allocation13 + $0x88] ss:$16 sps:$4 sm:$0xff]   ;;  %v2283_v24 = vld [vmem:[#allocation13 + $0x64] ss:$16 sps:$4 sm:$0xff]   ;;  %v2286_v25 = vld [vmem:[#allocation13 + $0x6c] ss:$16 sps:$4 sm:$0xff]  }
  0xf9   : > { %v2281_v26 = vld [vmem:[#allocation13 + $0x60] ss:$16 sps:$4 sm:$0xff]   ;;  %v2284_v27 = vld [vmem:[#allocation13 + $0x68] ss:$16 sps:$4 sm:$0xff]   ;;  %v2289_v28 = vld [vmem:[#allocation13 + $0x44] ss:$16 sps:$4 sm:$0xff]  }
  0xfa   : > { %v2292_v29 = vld [vmem:[#allocation13 + $0x4c] ss:$16 sps:$4 sm:$0xff]   ;;  %v2287_v30 = vld [vmem:[#allocation13 + $0x40] ss:$16 sps:$4 sm:$0xff]   ;;  %v2344_v6 = vld [vmem:[#allocation14 + $0x28] ss:$16 sps:$4 sm:$0xff]  }
  0xfb   : > { %768 = vmatpush1.bf16.msra.mxu0 %v2207_v31  ;;  %811 = vmatpush1.bf16.msra.mxu1 %v2208_v32  ;;  %v2290_v31 = vld [vmem:[#allocation13 + $0x48] ss:$16 sps:$4 sm:$0xff]   ;;  %v2295_v32 = vld [vmem:[#allocation13 + $0x24] ss:$16 sps:$4 sm:$0xff]   ;;  %v2298_v33 = vld [vmem:[#allocation13 + $0x2c] ss:$16 sps:$4 sm:$0xff]  }
  0xfc   : > { %999 = vmatprep.subr.bf16.mxu0 %v2211_v35  ;;  %1042 = vmatprep.subr.bf16.mxu1 %v2214_v36  ;;  %v2293_v34 = vld [vmem:[#allocation13 + $0x20] ss:$16 sps:$4 sm:$0xff]   ;;  %v2296_v35 = vld [vmem:[#allocation13 + $0x28] ss:$16 sps:$4 sm:$0xff]   ;;  %v2301_v36 = vld [vmem:[#allocation13 + $0x4] ss:$16 sps:$4 sm:$0xff]  }
  0xfd   : > { %v2341_v5 = vld [vmem:[#allocation14 + $0x20] ss:$16 sps:$4 sm:$0xff]   ;;  %s2050_s4 = sshll.u32 %s2743_s13, 9  ;;  %s3194_s17 = sld [smem:[#allocation35_spill]] }
  0xfe   : > { %786 = vmatmul.mubr.bf16.vlgmr.msra.gmra.mxu0 %v560_v37  ;;  %829 = vmatmul.mubr.bf16.vlgmr.msra.gmra.mxu1 %v560_v37  ;;  %v2304_v37 = vld [vmem:[#allocation13 + $0xc] ss:$16 sps:$4 sm:$0xff]   ;;  %s1702_s13 = scalar_lea.sflag [#allocation4], %s3006_s14  ;;  %s2569_s18 = scalar_lea.vmem %s3070_s5, 1024 }
  0xff   : > { %1000 = vmatpush1.bf16.msra.mxu0 %v2209_v38  ;;  %1043 = vmatpush1.bf16.msra.mxu1 %v2212_v39  ;;  %v2299_v38 = vld [vmem:[#allocation13] ss:$16 sps:$4 sm:$0xff]   ;;  %v2302_v39 = vld [vmem:[#allocation13 + $0x8] ss:$16 sps:$4 sm:$0xff]   ;;  %p2570_p13 = scmp.ne.s32.totalorder %s3070_s5, %s2569_s18  ;;  %p3195_p12 = scmp.ne.s32.totalorder %s3164_s21, 0 }
 0x100   : > { %1001 = vmatprep.subr.bf16.mxu0 %v2217_v40  ;;  %1044 = vmatprep.subr.bf16.mxu1 %v2220_v41  ;;  %v1085_v40 = vld [vmem:[%s447_s1] sm:$0xff]  ;;  %v1086_v41 = vld [vmem:[%s447_s1 + $0x8] sm:$0xff]  ;;  %s2668_s19 = smov [#allocation16]  }
 0x101   : > { %1031 = vmatprep.mubr.bf16.mxu0 %v2667_v0  ;;  %1074 = vmatprep.mubr.bf16.mxu1 %v2667_v0  ;;  %p2571_p9 = pnand %p2570_p13, %p3195_p12  ;;  %s2573_s25 = sshll.u32 %s2668_s19, 4  ;;  %s2574_s25 = int_to_ptr.vmem [resolvable:$false] %s2573_s25 }
 0x102   : > { %s2575_s15 = scalar_lea.vmem %s2574_s25, 2048  ;;  %p2576_p1 = scmp.lt.s32.totalorder %s3070_s5, %s2574_s25 }
 0x103   : > { %1002 = vmatpush1.bf16.msra.mxu0 %v2215_v42  ;;  %1045 = vmatpush1.bf16.msra.mxu1 %v2218_v43  ;;  %v2307_v42 = vld [vmem:[#allocation14 + $0xe4] ss:$16 sps:$4 sm:$0xff]   ;;  %v2310_v43 = vld [vmem:[#allocation14 + $0xec] ss:$16 sps:$4 sm:$0xff]   ;;  %s3075_s27 = scalar_lea.hbm %s3194_s17, %s2050_s4  ;;  %p2572_p10 = pneg %p2571_p9 }
 0x104   : > { %1003 = vmatprep.subr.bf16.mxu0 %v2223_v44  ;;  %1046 = vmatprep.subr.bf16.mxu1 %v2226_v45  ;;  %v1087_v44 = vpack.c.bf16 %v1086_v41, %v1085_v40  ;;  %v2305_v45 = vld [vmem:[#allocation14 + $0xe0] ss:$16 sps:$4 sm:$0xff]   ;;  %p2577_p5 = scmp.lt.s32.totalorder %s2575_s15, %s2569_s18 }
 0x105   : > { %v1663_v40 = vld [vmem:[%s3126_s8] sm:$0xf] }
 0x106   : > { %p2578_p3 = por %p2577_p5, %p2576_p1 }
 0x107   : > { %1004 = vmatpush1.bf16.msra.mxu0 %v2221_v46  ;;  %1047 = vmatpush1.bf16.msra.mxu1 %v2224_v47  ;;  %v2308_v46 = vld [vmem:[#allocation14 + $0xe8] ss:$16 sps:$4 sm:$0xff]   ;;  %v2313_v47 = vld [vmem:[#allocation14 + $0xc4] ss:$16 sps:$4 sm:$0xff]  }
 0x108   : > { %1005 = vmatprep.subr.bf16.mxu0 %v2229_v48  ;;  %1048 = vmatprep.subr.bf16.mxu1 %v2232_v49  ;;  %v2316_v48 = vld [vmem:[#allocation14 + $0xcc] ss:$16 sps:$4 sm:$0xff]   ;;  %v2311_v49 = vld [vmem:[#allocation14 + $0xc0] ss:$16 sps:$4 sm:$0xff]   ;;  %p2579_p4 = pnand %p2578_p3, %p2572_p10 }
 0x10b   : > { %1006 = vmatpush1.bf16.msra.mxu0 %v2227_v50  ;;  %1049 = vmatpush1.bf16.msra.mxu1 %v2230_v51  ;;  %v2314_v50 = vld [vmem:[#allocation14 + $0xc8] ss:$16 sps:$4 sm:$0xff]   ;;  %v2319_v51 = vld [vmem:[#allocation14 + $0xa4] ss:$16 sps:$4 sm:$0xff]  }
 0x10c   : > { %1007 = vmatprep.subr.bf16.mxu0 %v2235_v52  ;;  %1050 = vmatprep.subr.bf16.mxu1 %v2238_v53  ;;  %v2322_v52 = vld [vmem:[#allocation14 + $0xac] ss:$16 sps:$4 sm:$0xff]   ;;  %v2317_v53 = vld [vmem:[#allocation14 + $0xa0] ss:$16 sps:$4 sm:$0xff]  }
 0x10f   : > { %1008 = vmatpush1.bf16.msra.mxu0 %v2233_v54  ;;  %1051 = vmatpush1.bf16.msra.mxu1 %v2236_v55  ;;  %v2320_v54 = vld [vmem:[#allocation14 + $0xa8] ss:$16 sps:$4 sm:$0xff]   ;;  %v2325_v55 = vld [vmem:[#allocation14 + $0x84] ss:$16 sps:$4 sm:$0xff]  }
 0x110   : > { %1009 = vmatprep.subr.bf16.mxu0 %v2241_v56  ;;  %1052 = vmatprep.subr.bf16.mxu1 %v2244_v57  ;;  %v2328_v56 = vld [vmem:[#allocation14 + $0x8c] ss:$16 sps:$4 sm:$0xff]   ;;  %v2323_v57 = vld [vmem:[#allocation14 + $0x80] ss:$16 sps:$4 sm:$0xff]  }
 0x113   : > { %1010 = vmatpush1.bf16.msra.mxu0 %v2239_v58  ;;  %1053 = vmatpush1.bf16.msra.mxu1 %v2242_v59  ;;  %v2326_v58 = vld [vmem:[#allocation14 + $0x88] ss:$16 sps:$4 sm:$0xff]   ;;  %v2331_v59 = vld [vmem:[#allocation14 + $0x64] ss:$16 sps:$4 sm:$0xff]  }
 0x114   : > { %1011 = vmatprep.subr.bf16.mxu0 %v2247_v60  ;;  %1054 = vmatprep.subr.bf16.mxu1 %v2250_v61  ;;  %v2334_v60 = vld [vmem:[#allocation14 + $0x6c] ss:$16 sps:$4 sm:$0xff]   ;;  %v2329_v61 = vld [vmem:[#allocation14 + $0x60] ss:$16 sps:$4 sm:$0xff]  }
 0x117   : > { %1012 = vmatpush1.bf16.msra.mxu0 %v2245_v62  ;;  %1055 = vmatpush1.bf16.msra.mxu1 %v2248_v63  ;;  %v2337_v62 = vld [vmem:[#allocation14 + $0x44] ss:$16 sps:$4 sm:$0xff]   ;;  %v2340_v63 = vld [vmem:[#allocation14 + $0x4c] ss:$16 sps:$4 sm:$0xff]  }
 0x118   : > { %1013 = vmatprep.subr.bf16.mxu0 %v2253_v1  ;;  %1056 = vmatprep.subr.bf16.mxu1 %v2256_v2  ;;  %v2335_v1 = vld [vmem:[#allocation14 + $0x40] ss:$16 sps:$4 sm:$0xff]   ;;  %v2338_v2 = vld [vmem:[#allocation14 + $0x48] ss:$16 sps:$4 sm:$0xff]  }
 0x11b   : > { %1014 = vmatpush1.bf16.msra.mxu0 %v2251_v3  ;;  %1057 = vmatpush1.bf16.msra.mxu1 %v2254_v4  ;;  %v2343_v3 = vld [vmem:[#allocation14 + $0x24] ss:$16 sps:$4 sm:$0xff]   ;;  %v2346_v4 = vld [vmem:[#allocation14 + $0x2c] ss:$16 sps:$4 sm:$0xff]  }
 0x11c   : > { %1280 = vmatprep.subr.bf16.mxu0 %v2259_v7  ;;  %1323 = vmatprep.subr.bf16.mxu1 %v2262_v8  ;;  %v2349_v7 = vld [vmem:[#allocation14 + $0x4] ss:$16 sps:$4 sm:$0xff]   ;;  %v2352_v8 = vld [vmem:[#allocation14 + $0xc] ss:$16 sps:$4 sm:$0xff]  }
 0x11e   : > { %1032 = vmatmul.mubr.bf16.vlgmr.msra.gmra.mxu0 %v525_v9  ;;  %1075 = vmatmul.mubr.bf16.vlgmr.msra.gmra.mxu1 %v525_v9  ;;  %v2347_v9 = vld [vmem:[#allocation14] ss:$16 sps:$4 sm:$0xff]  }
 0x11f   : > { %1281 = vmatpush1.bf16.msra.mxu0 %v2257_v10  ;;  %1324 = vmatpush1.bf16.msra.mxu1 %v2260_v11  ;;  %v2350_v10 = vld [vmem:[#allocation14 + $0x8] ss:$16 sps:$4 sm:$0xff]   ;;  %v1374_v11 = vld [vmem:[%s456_s9] sm:$0xff] }
 0x120   : > { %1282 = vmatprep.subr.bf16.mxu0 %v2265_v12  ;;  %1325 = vmatprep.subr.bf16.mxu1 %v2268_v13  ;;  %v1375_v12 = vld [vmem:[%s456_s9 + $0x8] sm:$0xff] }
 0x121   : > { %1312 = vmatprep.mubr.bf16.mxu0 %v2667_v0  ;;  %1355 = vmatprep.mubr.bf16.mxu1 %v2667_v0  ;;  %v1376_v13 = vpack.c.bf16 %v1375_v12, %v1374_v11 }
 0x123   : > { %1283 = vmatpush1.bf16.msra.mxu0 %v2263_v14  ;;  %1326 = vmatpush1.bf16.msra.mxu1 %v2266_v15 }
 0x124   : > { %1284 = vmatprep.subr.bf16.mxu0 %v2271_v16  ;;  %1327 = vmatprep.subr.bf16.mxu1 %v2274_v17 }
 0x127   : > { %1285 = vmatpush1.bf16.msra.mxu0 %v2269_v18  ;;  %1328 = vmatpush1.bf16.msra.mxu1 %v2272_v19 }
 0x128   : > { %1286 = vmatprep.subr.bf16.mxu0 %v2277_v20  ;;  %1329 = vmatprep.subr.bf16.mxu1 %v2280_v21 }
 0x12b   : > { %1287 = vmatpush1.bf16.msra.mxu0 %v2275_v22  ;;  %1330 = vmatpush1.bf16.msra.mxu1 %v2278_v23 }
 0x12c   : > { %1288 = vmatprep.subr.bf16.mxu0 %v2283_v24  ;;  %1331 = vmatprep.subr.bf16.mxu1 %v2286_v25 }
 0x12f   : > { %1289 = vmatpush1.bf16.msra.mxu0 %v2281_v26  ;;  %1332 = vmatpush1.bf16.msra.mxu1 %v2284_v27 }
 0x130   : > { %1290 = vmatprep.subr.bf16.mxu0 %v2289_v28  ;;  %1333 = vmatprep.subr.bf16.mxu1 %v2292_v29 }
 0x133   : > { %1291 = vmatpush1.bf16.msra.mxu0 %v2287_v30  ;;  %1334 = vmatpush1.bf16.msra.mxu1 %v2290_v31 }
 0x134   : > { %1292 = vmatprep.subr.bf16.mxu0 %v2295_v32  ;;  %1335 = vmatprep.subr.bf16.mxu1 %v2298_v33  ;;  %v1665_v32 = vlaneseq }
 0x137   : > { %1293 = vmatpush1.bf16.msra.mxu0 %v2293_v34  ;;  %1336 = vmatpush1.bf16.msra.mxu1 %v2296_v35  ;;  %v1666_v35 = vshrl.u32 %v1665_v32, 7 }
 0x138   : > { %1294 = vmatprep.subr.bf16.mxu0 %v2301_v36  ;;  %1337 = vmatprep.subr.bf16.mxu1 %v2304_v37 }
 0x139   : > { %v1671_v41 = vsub.s32 1, %v1666_v35 }
 0x13b   : > { %1295 = vmatpush1.bf16.msra.mxu0 %v2299_v38  ;;  %1338 = vmatpush1.bf16.msra.mxu1 %v2302_v39  ;;  %v1667_v38 = vsub.s32 0, %v1666_v35  ;;  %v1675_v39 = vsub.s32 2, %v1666_v35 }
 0x13c   : > { %1569 = vmatprep.subr.bf16.mxu0 %v2307_v42  ;;  %1612 = vmatprep.subr.bf16.mxu1 %v2310_v43  ;;  %v1679_v42 = vsub.s32 3, %v1666_v35 }
 0x13e   : > { %1313 = vmatmul.mubr.bf16.vlgmr.msra.gmra.mxu0 %v1087_v44  ;;  %1356 = vmatmul.mubr.bf16.vlgmr.msra.gmra.mxu1 %v1087_v44 }
 0x13f   : > { %1570 = vmatpush1.bf16.msra.mxu0 %v2305_v45  ;;  %1613 = vmatpush1.bf16.msra.mxu1 %v2308_v46 }
 0x140   : > { %1571 = vmatprep.subr.bf16.mxu0 %v2313_v47  ;;  %1614 = vmatprep.subr.bf16.mxu1 %v2316_v48  ;;  %v1668_v47 = vrot.slane %v1663_v40, %v1667_v38  ;;  %v1676_v48 = vrot.slane %v1663_v40, %v1675_v39 }
 0x141   : > { %1601 = vmatprep.mubr.bf16.mxu0 %v2667_v0  ;;  %1644 = vmatprep.mubr.bf16.mxu1 %v2667_v0  ;;  %v2332_v0 = vld [vmem:[#allocation14 + $0x68] ss:$16 sps:$4 sm:$0xff]  }
 0x143   : > { %1572 = vmatpush1.bf16.msra.mxu0 %v2311_v49  ;;  %1615 = vmatpush1.bf16.msra.mxu1 %v2314_v50 }
 0x144   : > { %1573 = vmatprep.subr.bf16.mxu0 %v2319_v51  ;;  %1616 = vmatprep.subr.bf16.mxu1 %v2322_v52 }
 0x147   : > { %1574 = vmatpush1.bf16.msra.mxu0 %v2317_v53  ;;  %1617 = vmatpush1.bf16.msra.mxu1 %v2320_v54 }
 0x148   : > { %1575 = vmatprep.subr.bf16.mxu0 %v2325_v55  ;;  %1618 = vmatprep.subr.bf16.mxu1 %v2328_v56 }
 0x14b   : > { %1576 = vmatpush1.bf16.msra.mxu0 %v2323_v57  ;;  %1619 = vmatpush1.bf16.msra.mxu1 %v2326_v58  ;;  %v1672_v57 = vrot.slane %v1663_v40, %v1671_v41  ;;  %v1680_v58 = vrot.slane %v1663_v40, %v1679_v42 }
 0x14c   : > { %1577 = vmatprep.subr.bf16.mxu0 %v2331_v59  ;;  %1620 = vmatprep.subr.bf16.mxu1 %v2334_v60 }
 0x14f   : > { %1578 = vmatpush1.bf16.msra.mxu0 %v2329_v61  ;;  %1621 = vmatpush1.bf16.msra.mxu1 %v2332_v0 }
 0x150   : > { %1579 = vmatprep.subr.bf16.mxu0 %v2337_v62  ;;  %1622 = vmatprep.subr.bf16.mxu1 %v2340_v63 }
 0x153   : > { %1580 = vmatpush1.bf16.msra.mxu0 %v2335_v1  ;;  %1623 = vmatpush1.bf16.msra.mxu1 %v2338_v2 }
 0x154   : > { %1581 = vmatprep.subr.bf16.mxu0 %v2343_v3  ;;  %1624 = vmatprep.subr.bf16.mxu1 %v2346_v4 }
 0x157   : > { %1582 = vmatpush1.bf16.msra.mxu0 %v2341_v5  ;;  %1625 = vmatpush1.bf16.msra.mxu1 %v2344_v6 }
 0x158   : > { %1583 = vmatprep.subr.bf16.mxu0 %v2349_v7  ;;  %1626 = vmatprep.subr.bf16.mxu1 %v2352_v8 }
 0x15b   : > { %1584 = vmatpush1.bf16.msra.mxu0 %v2347_v9  ;;  %1627 = vmatpush1.bf16.msra.mxu1 %v2350_v10 }
 0x15e   : > { %1602 = vmatmul.mubr.bf16.vlgmr.msra.gmra.mxu0 %v1376_v13  ;;  %1645 = vmatmul.mubr.bf16.vlgmr.msra.gmra.mxu1 %v1376_v13 }
 0x1be   : > { %v787_v14 = vpop.f32.mrf.mxu0  ;;  %v830_v15 = vpop.f32.mrf.mxu1 }
 0x1c0   : > { %v789_v16 = vpop.f32.mrf.mxu0  ;;  %v832_v17 = vpop.f32.mrf.mxu1 }
 0x1c2   : > { %v791_v18 = vpop.f32.mrf.mxu0  ;;  %v834_v19 = vpop.f32.mrf.mxu1 }
 0x1c4   : > { %v793_v20 = vpop.f32.mrf.mxu0  ;;  %v836_v21 = vpop.f32.mrf.mxu1 }
 0x1de   : > { %v1033_v22 = vpop.f32.mrf.mxu0  ;;  %v1076_v23 = vpop.f32.mrf.mxu1 }
 0x1df   : > { %v1034_v43 = vadd.f32 %v1033_v22, %v787_v14  ;;  %v1077_v44 = vadd.f32 %v1076_v23, %v830_v15 }
 0x1e0   : > { %v1035_v24 = vpop.f32.mrf.mxu0  ;;  %v1078_v25 = vpop.f32.mrf.mxu1 }
 0x1e1   : > { %v1036_v49 = vadd.f32 %v1035_v24, %v789_v16  ;;  %v1079_v50 = vadd.f32 %v1078_v25, %v832_v17 }
 0x1e2   : > { %v1037_v26 = vpop.f32.mrf.mxu0  ;;  %v1080_v27 = vpop.f32.mrf.mxu1 }
 0x1e3   : > { %v1038_v53 = vadd.f32 %v1037_v26, %v791_v18  ;;  %v1081_v54 = vadd.f32 %v1080_v27, %v834_v19 }
 0x1e4   : > { %v1039_v28 = vpop.f32.mrf.mxu0  ;;  %v1082_v29 = vpop.f32.mrf.mxu1 }
 0x1e5   : > { %v1040_v62 = vadd.f32 %v1039_v28, %v793_v20  ;;  %v1083_v63 = vadd.f32 %v1082_v29, %v836_v21 }
 0x1fe   : > { %v1314_v30 = vpop.f32.mrf.mxu0  ;;  %v1357_v31 = vpop.f32.mrf.mxu1 }
 0x1ff   : > { %v1366_v51 = vadd.f32 %v1314_v30, %v1034_v43  ;;  %v1368_v52 = vadd.f32 %v1357_v31, %v1077_v44 }
 0x200   : > { %v1316_v33 = vpop.f32.mrf.mxu0  ;;  %v1359_v34 = vpop.f32.mrf.mxu1 }
 0x201   : > { %v1367_v59 = vadd.f32 %v1316_v33, %v1036_v49  ;;  %v1369_v60 = vadd.f32 %v1359_v34, %v1079_v50 }
 0x202   : > { %v1318_v36 = vpop.f32.mrf.mxu0  ;;  %v1361_v37 = vpop.f32.mrf.mxu1 }
 0x203   : > { %v1370_v1 = vadd.f32 %v1318_v36, %v1038_v53  ;;  %v1372_v2 = vadd.f32 %v1361_v37, %v1081_v54 }
 0x204   : > { %v1320_v45 = vpop.f32.mrf.mxu0  ;;  %v1363_v46 = vpop.f32.mrf.mxu1 }
 0x205   : > { %v1371_v9 = vadd.f32 %v1320_v45, %v1040_v62  ;;  %v1373_v10 = vadd.f32 %v1363_v46, %v1083_v63 }
 0x21e   : > { %v1603_v55 = vpop.f32.mrf.mxu0  ;;  %v1646_v56 = vpop.f32.mrf.mxu1 }
 0x21f   : > { %v1655_v61 = vadd.f32 %v1603_v55, %v1366_v51  ;;  %v1657_v0 = vadd.f32 %v1646_v56, %v1368_v52 }
 0x220   : > { %v1605_v3 = vpop.f32.mrf.mxu0  ;;  %v1648_v4 = vpop.f32.mrf.mxu1 }
 0x221   : > { %v1685_v5 = vadd.f32 %v1668_v47, %v1655_v61  ;;  %v1687_v6 = vadd.f32 %v1676_v48, %v1657_v0  ;;  %v1656_v7 = vadd.f32 %v1605_v3, %v1367_v59  ;;  %v1658_v8 = vadd.f32 %v1648_v4, %v1369_v60 }
 0x222   : > { %v1607_v11 = vpop.f32.mrf.mxu0  ;;  %v1650_v12 = vpop.f32.mrf.mxu1 }
 0x223   : > { %1693 = vst [vmem:[%s521_s26] sm:$0xff] %v1685_v5  ;;  %1695 = vst [vmem:[%s521_s26 + $0x10] sm:$0xff] %v1687_v6  ;;  %v1686_v13 = vadd.f32 %v1672_v57, %v1656_v7  ;;  %v1688_v14 = vadd.f32 %v1680_v58, %v1658_v8  ;;  %v1659_v15 = vadd.f32 %v1607_v11, %v1370_v1 }
 0x224   : > { %v1661_v16 = vadd.f32 %v1650_v12, %v1372_v2  ;;  %v1609_v17 = vpop.f32.mrf.mxu0  ;;  %v1652_v18 = vpop.f32.mrf.mxu1 }
 0x225   : > { %1694 = vst [vmem:[%s521_s26 + $0x8] sm:$0xff] %v1686_v13  ;;  %1696 = vst [vmem:[%s521_s26 + $0x18] sm:$0xff] %v1688_v14  ;;  %v1689_v19 = vadd.f32 %v1668_v47, %v1659_v15  ;;  %v1660_v21 = vadd.f32 %v1609_v17, %v1371_v9  ;;  %v1662_v22 = vadd.f32 %v1652_v18, %v1373_v10 }
 0x226   : > { %v1691_v20 = vadd.f32 %v1676_v48, %v1661_v16 }
 0x227   : > { %1697 = vst [vmem:[%s521_s26 + $0x20] sm:$0xff] %v1689_v19  ;;  %v1690_v23 = vadd.f32 %v1672_v57, %v1660_v21  ;;  %v1692_v24 = vadd.f32 %v1680_v58, %v1662_v22 }
 0x228   : > { %1699 = vst [vmem:[%s521_s26 + $0x30] sm:$0xff] %v1691_v20 }
 0x229   : > { %1698 = vst [vmem:[%s521_s26 + $0x28] sm:$0xff] %v1690_v23  ;;  %1700 = vst [vmem:[%s521_s26 + $0x38] sm:$0xff] %v1692_v24 }
 0x22a   : > { %2582 = shalt.err (!%p2579_p4)
}
 0x22b   : > { %s2583_s0 = scalar_lea.hbm %s3075_s27, 1024  ;;  %s2587_s23 = scalar_lea.hbm %s3194_s17, 2048 }
 0x22c   : > { %p2584_p8 = scmp.ne.s32.totalorder %s3075_s27, %s2583_s0  ;;  %p2588_p0 = scmp.lt.s32.totalorder %s3075_s27, %s3194_s17 }
 0x22d   : > { %p2589_p7 = scmp.lt.s32.totalorder %s2587_s23, %s2583_s0 }
 0x22e   : > { %p2585_p6 = pnand %p2584_p8, %p3195_p12 }
 0x22f   : > { %p2590_p11 = por %p2589_p7, %p2588_p0 }
 0x230   : > { %p2586_p2 = pneg %p2585_p6 }
 0x232   : > { %p2591_p13 = pnand %p2590_p11, %p2586_p2 }
 0x234   : > { %2594 = shalt.err (!%p2591_p13)
}
 0x235   : > { %s2669_s1 = smov 512   ;;  %s2670_s22 = smov 1024  }
 0x236   : > { %s2671_s9 = smov 32  }
 0x237   : > { %2075 = dma.vmem_to_hbm [thread:$0]  (%p3195_p12), %s3070_s5, 1024, %s3075_s27, %s1702_s13, %s2669_s1, %s2670_s22, %s2671_s9  }
 0x238 PF: > { %s3196_s20 = sld [smem:[#allocation24_spill]]  ;;  %p3199_p10 = scmp.ge.s32.totalorder %s2653_s12, 2 }
 0x239   : > { %s3197_s11 = sld [smem:[#allocation28_spill]] }
 0x23e   : > { %s1730_s28 = sand.u32 1, %s3196_s20  }
 0x23f   : > { %p3198_p9 = scmp.ne.s32.totalorder %s3197_s11, 0  ;;  %s1731_s26 = scalar_lea.sflag [#allocation4], %s1730_s28 }
 0x241   : > { %p2104_p1 = pnand %p3199_p10, %p3198_p9 }
 0x243   : > { %p2105_p5 = pneg %p2104_p1 }
 0x245   : > { %2636 = dma.done.wait (%p2105_p5), %s1731_s26, 1024  }
 0x246   : > { %2638 = vsyncadd (%p2105_p5), %s1731_s26, 4294966272  ;;  %s3200_s12 = sld [smem:[#allocation26_spill]]  ;;  %s3203_s30 = smov %s2645_s10 }
 0x247   : > { %s3201_s4 = sld [smem:[#allocation25_spill]] }
 0x248   : > { %s3202_s11 = sld [smem:[#allocation27_spill]] }
 0x24c   : > { %p30_p3 = scmp.ge.s32.totalorder %s3200_s12, 4  }
 0x24d   : > { %s3204_s10 = smov %s3201_s4 }
 0x24e   :  { %32 = sbr.rel (!%p30_p3) target bundleno = 19 (0x13), region = 154 }
 0x253   :  { %1736 = vsyncpa [#allocation3], 1 }
 0x254   :  { %1738 = vsyncpa [#allocation3 + $0x1], 1 }
 0x255   :  { %1739 = vsyncpa [#allocation6], 1 }
 0x256   :  { %1741 = vsyncpa [#allocation6 + $0x1], 1 }
 0x257   :  { %1742 = vsyncpa [#allocation9], 1 }
 0x258   :  { %1744 = vsyncpa [#allocation9 + $0x1], 1 }
 0x259   :  { %1745 = vsyncpa [#allocation12], 1 }
 0x25a   :  { %1746 = vsyncpa [#allocation15], 1 }
 0x25b   :  { %1747 = vsyncpa [#allocation4], 1 }
 0x25c   :  { %1749 = vsyncpa [#allocation4 + $0x1], 1 }

</bundles_post_ra>
